<compile_context>
chip_gen: v7x
topology: tpu7x:2x2x1
jax: 0.10.0
libtpu: 0.0.40
codegen_flags: <defaults>
</compile_context>

<pallas_src>
import functools

import jax
import jax.numpy as jnp
from jax import lax
from jax.experimental import pallas as pl
from jax.experimental.pallas import tpu as pltpu


def _round_up(x, m):
    return -(-x // m) * m


def _vmem_capacity_bytes():
    # Generation-aware VMEM capacity (v5e/v6e: 128 MiB, v7x: 64 MiB per TC).
    try:
        return int(pltpu.get_tpu_info().vmem_capacity_bytes)
    except Exception:
        return 64 << 20  # conservative (v7x-sized) fallback


# ---------------------------------------------------------------------------
# Main path: (N, C, HW) blocks; C on sublanes (reduction), HW on lanes.
# ---------------------------------------------------------------------------
def _layernorm_chw_kernel(eps, x_ref, g_ref, o_ref):
    # x_ref: (nb, C, hw_tile).  Reduce over C (sublane axis, XLU).
    x = x_ref[...].astype(jnp.float32)
    mean = jnp.mean(x, axis=1, keepdims=True)              # (nb, 1, hw_tile)
    xc = x - mean
    var = jnp.mean(xc * xc, axis=1, keepdims=True)         # unbiased=False
    inv = lax.rsqrt(var + eps)                             # EUP slot
    g = g_ref[...].astype(jnp.float32)                     # (1, C, 1) once/block
    o_ref[...] = (xc * inv * g).astype(o_ref.dtype)


def _block_vmem_need(nb, C, hw_tile, itemsize):
    """Real buffer set: 2x input + 2x output (native dtype) + ~3 f32 temps."""
    sub = max(8, 32 // itemsize)                           # sublane packing
    native = nb * _round_up(C, sub) * hw_tile * itemsize
    f32 = nb * _round_up(C, 8) * hw_tile * 4
    return 2 * native + 2 * native + 3 * f32


def _choose_tiling(N, C, HW, itemsize, vmem_cap):
    """Return (nb, n_b, hw_tile, n_hw, vmem_limit) with dtype/generation-aware sizing."""
    vmem_limit_cap = int(vmem_cap * 3 // 4)                # ~48 MiB v7x, ~96 MiB v5e/v6e
    headroom = 8 << 20                                     # Mosaic internal scratch
    target = max(512 << 10, vmem_cap // 16)                # ~4 MiB v7x, ~8 MiB v5e/v6e

    # Dtype-aware HBM block sizing (bf16 blocks are sized at bf16 width now).
    bytes_per_lane = _round_up(C, max(8, 32 // itemsize)) * itemsize

    # Guard: a minimal (1, C, 128) block plus its f32 temporaries must fit.
    if _block_vmem_need(1, C, 128, itemsize) + headroom > vmem_limit_cap:
        # TODO(synk): add a C-tiled two-pass path (C grid axis 'arbitrary' with
        # partial-sum scratch) for extremely wide channel counts.
        raise NotImplementedError(
            f"Channel dim C={C} too wide for a single-block VMEM reduction.")

    while True:
        # Largest lane tile (multiple of 128) keeping a 1-batch block <= target.
        max_lanes = max(128, (target // bytes_per_lane) // 128 * 128)
        if HW <= max_lanes:
            hw_tile, n_hw = HW, 1            # full extent: always a legal block dim
        else:
            hw_tile = max_lanes              # multiple of 128 -> lane-dense stores
            n_hw = pl.cdiv(HW, hw_tile)
        per_batch = bytes_per_lane * hw_tile
        nb = max(1, min(N, target // per_batch))
        n_b = pl.cdiv(N, nb)

        # Guarantee >= 2 grid steps on a parallel axis: a 1-step grid serializes
        # on a single v7x TensorCore and disables double buffering.
        if n_b * n_hw == 1:
            if HW >= 256:
                hw_tile = max(128, _round_up(HW // 2, 128))
                while pl.cdiv(HW, hw_tile) < 2 and hw_tile > 128:
                    hw_tile -= 128
                n_hw = pl.cdiv(HW, hw_tile)
            elif N > 1:
                nb = -(-N // 2)
                n_b = pl.cdiv(N, nb)

        # Prefer an even total step count (no straggler step on a 2-TC part).
        if (n_b * n_hw) % 2 == 1 and n_b * n_hw > 1:
            if n_hw == 1:
                for nb2 in range(nb, max(0, nb - 8), -1):
                    if pl.cdiv(N, nb2) % 2 == 0:
                        nb, n_b = nb2, pl.cdiv(N, nb2)
                        break
            elif n_b == 1 and hw_tile > 128:
                for hw2 in range(hw_tile, max(127, hw_tile - 4 * 128), -128):
                    if hw2 >= 128 and pl.cdiv(HW, hw2) % 2 == 0:
                        hw_tile, n_hw = hw2, pl.cdiv(HW, hw2)
                        break

        need = _block_vmem_need(nb, C, hw_tile, itemsize) + headroom
        if need <= vmem_limit_cap or target <= (512 << 10):
            vmem_limit = int(min(vmem_limit_cap, max(32 << 20, need)))
            return nb, n_b, hw_tile, n_hw, vmem_limit
        target //= 2                         # shrink and retry (stays correct)


# ---------------------------------------------------------------------------
# Escape hatch for small / lane-unfriendly HW with lane-friendly C:
# normalize in an NHWC view so every store is an unmasked 128-lane vst.
# ---------------------------------------------------------------------------
def _layernorm_rows_kernel(eps, x_ref, g_ref, o_ref):
    # x_ref: (rows_tile, C).  Reduce over C (lane axis, XLU); lane-dense stores.
    x = x_ref[...].astype(jnp.float32)
    mean = jnp.mean(x, axis=-1, keepdims=True)
    xc = x - mean
    var = jnp.mean(xc * xc, axis=-1, keepdims=True)
    inv = lax.rsqrt(var + eps)
    g = g_ref[...].astype(jnp.float32)                     # (1, C)
    o_ref[...] = (xc * inv * g).astype(o_ref.dtype)


def _layernorm_channels_last(x, gamma, eps):
    N, C, H, W = x.shape
    rows = N * H * W
    x2 = jnp.transpose(x, (0, 2, 3, 1)).reshape(rows, C)
    g2 = gamma.reshape(1, C)
    itemsize = jnp.dtype(x.dtype).itemsize
    cap = _vmem_capacity_bytes()
    target = max(512 << 10, cap // 16)
    row_bytes = _round_up(C, 128) * itemsize

    rows_tile = max(8, min(_round_up(rows, 8), (target // row_bytes) // 8 * 8))
    if rows_tile >= rows:
        rows_tile, n_rows = rows, 1          # full extent: legal block dim
        if rows >= 16:                       # keep >= 2 steps for megacore
            rows_tile = _round_up(-(-rows // 2), 8)
            n_rows = pl.cdiv(rows, rows_tile)
    else:
        n_rows = pl.cdiv(rows, rows_tile)

    need = 4 * rows_tile * row_bytes + 3 * rows_tile * _round_up(C, 128) * 4 + (8 << 20)
    vmem_limit = int(min(cap * 3 // 4, max(32 << 20, need)))

    kernel = functools.partial(_layernorm_rows_kernel, float(eps))
    out = pl.pallas_call(
        kernel,
        out_shape=jax.ShapeDtypeStruct((rows, C), x.dtype),
        grid_spec=pltpu.PrefetchScalarGridSpec(
            num_scalar_prefetch=0,
            grid=(n_rows,),
            in_specs=[
                pl.BlockSpec((rows_tile, C), lambda r: (r, 0)),
                pl.BlockSpec((1, C), lambda r: (0, 0)),
            ],
            out_specs=pl.BlockSpec((rows_tile, C), lambda r: (r, 0)),
        ),
        compiler_params=pltpu.CompilerParams(
            dimension_semantics=("parallel",),
            vmem_limit_bytes=vmem_limit,
        ),
    )(x2, g2)
    return jnp.transpose(out.reshape(N, H, W, C), (0, 3, 1, 2))


# ---------------------------------------------------------------------------
# Public wrapper
# ---------------------------------------------------------------------------
def layernorm_nchw(x, gamma, eps=1e-5):
    """x: (N, C, H, W), gamma: (1, C, 1, 1). Normalize over dim=1 (PyTorch semantics)."""
    N, C, H, W = x.shape
    HW = H * W

    # Small-HW escape hatch (7x7, 14x14, ...): masked lane stores dominate in the
    # NCHW mapping, so switch to a channels-last view when C is lane-friendly.
    if (HW % 128 != 0) and (C % 128 == 0):
        return _layernorm_channels_last(x, gamma, eps)

    x3 = x.reshape(N, C, HW)
    g3 = gamma.reshape(1, C, 1)
    itemsize = jnp.dtype(x.dtype).itemsize
    cap = _vmem_capacity_bytes()
    nb, n_b, hw_tile, n_hw, vmem_limit = _choose_tiling(N, C, HW, itemsize, cap)

    cost = pl.CostEstimate(
        flops=7 * N * C * HW,
        transcendentals=N * HW,
        bytes_accessed=2 * N * C * HW * itemsize + C * jnp.dtype(gamma.dtype).itemsize,
    )

    kernel = functools.partial(_layernorm_chw_kernel, float(eps))
    out = pl.pallas_call(
        kernel,
        out_shape=jax.ShapeDtypeStruct((N, C, HW), x.dtype),
        grid_spec=pltpu.PrefetchScalarGridSpec(
            num_scalar_prefetch=0,
            grid=(n_b, n_hw),
            in_specs=[
                # TODO(synk): if xprof shows exposed DMA during ramp-up on very
                # short grids, add pipeline_mode=pl.Buffered(3) to this spec only.
                pl.BlockSpec((nb, C, hw_tile), lambda b, h: (b, 0, h)),
                pl.BlockSpec((1, C, 1), lambda b, h: (0, 0, 0)),
            ],
            out_specs=pl.BlockSpec((nb, C, hw_tile), lambda b, h: (b, 0, h)),
        ),
        compiler_params=pltpu.CompilerParams(
            dimension_semantics=("parallel", "parallel"),
            vmem_limit_bytes=vmem_limit,
        ),
        cost_estimate=cost,
    )(x3, g3)
    return out.reshape(N, C, H, W)


def layernorm_ref(x, gamma, eps=1e-5):
    mean = jnp.mean(x, axis=1, keepdims=True)
    var = jnp.mean((x - mean) ** 2, axis=1, keepdims=True)
    return (x - mean) / jnp.sqrt(var + eps) * gamma


if __name__ == "__main__":
    key = jax.random.PRNGKey(0)

    # Main path (HW multiple of 128): matches the module's typical use.
    N, C, H, W = 2, 4, 16, 16
    x = jax.random.normal(key, (N, C, H, W), dtype=jnp.float32)
    gamma = jnp.ones((1, C, 1, 1), dtype=jnp.float32)  # nn.Parameter(torch.ones(1, dim, 1, 1))
    out = jax.block_until_ready(layernorm_nchw(x, gamma))
    ref = layernorm_ref(x, gamma)
    assert out.shape == (N, C, H, W)
    assert jnp.allclose(out, ref, atol=1e-5, rtol=1e-5), "mismatch vs reference (main path)"

    # Channels-last escape hatch (small feature map, lane-friendly C).
    N2, C2, H2, W2 = 2, 128, 7, 7
    x2 = jax.random.normal(jax.random.PRNGKey(1), (N2, C2, H2, W2), dtype=jnp.float32)
    gamma2 = jnp.ones((1, C2, 1, 1), dtype=jnp.float32)
    out2 = jax.block_until_ready(layernorm_nchw(x2, gamma2))
    ref2 = layernorm_ref(x2, gamma2)
    assert out2.shape == (N2, C2, H2, W2)
    assert jnp.allclose(out2, ref2, atol=1e-5, rtol=1e-5), "mismatch vs reference (NHWC path)"

    print("KERNEL_OK")
</pallas_src>

<mosaic_0001>
module attributes {stable_mosaic.version = 11 : i64} {
  func.func @_layernorm_chw_kernel(%arg0: i32, %arg1: i32, %arg2: memref<2x4x128xf32, #tpu.memory_space<vmem>>, %arg3: memref<1x4x1xf32, #tpu.memory_space<vmem>>, %arg4: memref<2x4x128xf32, #tpu.memory_space<vmem>>) attributes {dimension_semantics = [#tpu.dimension_semantics<parallel>, #tpu.dimension_semantics<parallel>], iteration_bounds = array<i64: 1, 2>, scalar_prefetch = 0 : i64, scratch_operands = 0 : i64, tpu.core_type = #tpu.core_type<tc>, window_params = [{transform_indices = @transform_0, window_bounds = array<i64: 2, 4, 128>}, {pipeline_mode = #tpu.pipeline_mode<synchronous>, transform_indices = @transform_1, window_bounds = array<i64: 1, 4, 1>}, {transform_indices = @transform_2, window_bounds = array<i64: 2, 4, 128>}]} {
    %c0 = arith.constant 0 : index
    %c0_0 = arith.constant 0 : index
    %c0_1 = arith.constant 0 : index
    %0 = vector.load %arg2[%c0, %c0_0, %c0_1] : memref<2x4x128xf32, #tpu.memory_space<vmem>>, vector<2x4x128xf32>
    %cst = arith.constant dense<0.000000e+00> : vector<2x128xf32>
    %1 = vector.multi_reduction <add>, %0, %cst [1] : vector<2x4x128xf32> to vector<2x128xf32>
    %2 = vector.shape_cast %1 : vector<2x128xf32> to vector<2x1x128xf32>
    %cst_2 = arith.constant 4.000000e+00 : f32
    %3 = vector.broadcast %cst_2 : f32 to vector<2x1x128xf32>
    %4 = arith.divf %2, %3 : vector<2x1x128xf32>
    %5 = vector.broadcast %4 : vector<2x1x128xf32> to vector<2x4x128xf32>
    %6 = arith.subf %0, %5 : vector<2x4x128xf32>
    %7 = arith.mulf %6, %6 : vector<2x4x128xf32>
    %cst_3 = arith.constant dense<0.000000e+00> : vector<2x128xf32>
    %8 = vector.multi_reduction <add>, %7, %cst_3 [1] : vector<2x4x128xf32> to vector<2x128xf32>
    %9 = vector.shape_cast %8 : vector<2x128xf32> to vector<2x1x128xf32>
    %cst_4 = arith.constant 4.000000e+00 : f32
    %10 = vector.broadcast %cst_4 : f32 to vector<2x1x128xf32>
    %11 = arith.divf %9, %10 : vector<2x1x128xf32>
    %cst_5 = arith.constant 9.99999974E-6 : f32
    %12 = vector.broadcast %cst_5 : f32 to vector<2x1x128xf32>
    %13 = arith.addf %11, %12 : vector<2x1x128xf32>
    %14 = math.rsqrt %13 : vector<2x1x128xf32>
    %c0_6 = arith.constant 0 : index
    %c0_7 = arith.constant 0 : index
    %c0_8 = arith.constant 0 : index
    %15 = vector.load %arg3[%c0_6, %c0_7, %c0_8] : memref<1x4x1xf32, #tpu.memory_space<vmem>>, vector<1x4x1xf32>
    %16 = vector.broadcast %14 : vector<2x1x128xf32> to vector<2x4x128xf32>
    %17 = arith.mulf %6, %16 : vector<2x4x128xf32>
    %18 = vector.broadcast %15 : vector<1x4x1xf32> to vector<2x4x128xf32>
    %19 = arith.mulf %17, %18 : vector<2x4x128xf32>
    %c0_9 = arith.constant 0 : index
    %c0_10 = arith.constant 0 : index
    %c0_11 = arith.constant 0 : index
    %20 = vector.load %arg4[%c0_9, %c0_10, %c0_11] : memref<2x4x128xf32, #tpu.memory_space<vmem>>, vector<2x4x128xf32>
    tpu.vector_store %arg4[%c0_9, %c0_10, %c0_11], %19 {strides = array<i32>} : memref<2x4x128xf32, #tpu.memory_space<vmem>>, vector<2x4x128xf32>,
    return
  }
  func.func @transform_0(%arg0: i32, %arg1: i32) -> (i32, i32, i32) {
    %c0_i32 = arith.constant 0 : i32
    %c0_i32_0 = arith.constant 0 : i32
    return %arg0, %c0_i32, %arg1 : i32, i32, i32
  }
  func.func @transform_1(%arg0: i32, %arg1: i32) -> (i32, i32, i32) {
    %c0_i32 = arith.constant 0 : i32
    %c0_i32_0 = arith.constant 0 : i32
    %c0_i32_1 = arith.constant 0 : i32
    %c0_i32_2 = arith.constant 0 : i32
    return %c0_i32, %c0_i32_0, %c0_i32_1 : i32, i32, i32
  }
  func.func @transform_2(%arg0: i32, %arg1: i32) -> (i32, i32, i32) {
    %c0_i32 = arith.constant 0 : i32
    %c0_i32_0 = arith.constant 0 : i32
    return %arg0, %c0_i32, %arg1 : i32, i32, i32
  }
}

</mosaic_0001>

<bundles_post_ra>
// kernel: tpu_custom_call.1
= control target key start
LH: loop header
LB: loop body
LE: loop exit
PB: predicated region body
PF: predicated region fallthrough
CT: control target
= control target key end

     0   :  { %7 = vsyncpa [#allocation3], 0  ;;  %s748_s0 = inlined_call_operand.hbm [shape: f32[2,4,256], index: 0, kind: input, shape index: {}]   ;;  %s749_s1 = inlined_call_operand.vmem [shape: f32[1,4,1], index: 1, kind: input, shape index: {}]   ;;  %s750_s2 = inlined_call_operand.hbm [shape: f32[2,4,256], index: 2, kind: output, shape index: {}]  }
   0x1   :  { %9 = vsyncpa [#allocation3 + $0x1], 0 }
   0x2   :  { %10 = vsyncpa [#allocation4], 0 }
   0x3   :  { %12 = vsyncpa [#allocation4 + $0x1], 0  ;;  %s564_s9 = smov 0   ;;  %s566_s10 = smov 0  }
   0x4   :  { %s568_s11 = smov 0   ;;  %s570_s12 = smov 0  }
   0x5   :  { %s572_s13 = smov 0   ;;  %s574_s14 = smov 0  }
   0x6 LB: > { %s339_s15 = sadd.s32 4294967295, %s538_s14   ;;  %s340_s16 = sadd.s32 4294967294, %s538_s14   ;;  %s538_s14 = sphi %s574_s14, %s18_s14   ;;  %s534_s13 = sphi %s572_s13, %s764_s13   ;;  %s530_s12 = sphi %s570_s12, %s763_s12   ;;  %s526_s11 = sphi %s568_s11, %s762_s11   ;;  %s522_s10 = sphi %s566_s10, %s761_s10   ;;  %s518_s9 = sphi %s564_s9, %s760_s9  }
   0x7   : > { %s27_s17 = sadd.s32 1, %s534_s13  ;;  %s39_s18 = sadd.s32 1, %s526_s11 }
   0x8   : > { %p28_p0 = scmp.ge.s32.totalorder %s27_s17, 2  ;;  %p46_p1 = scmp.ne.s32.totalorder %s526_s11, %s522_s10 }
   0x9   : > { %p47_p2 = scmp.eq.s32.totalorder %s538_s14, 0  ;;  %p52_p3 = scmp.ne.s32.totalorder %s522_s10, %s518_s9 }
   0xa   : > { %s766_s17 = smov (%p28_p0, %s27_s17), 0  ;;  %p53_p5 = scmp.eq.s32.totalorder %s339_s15, 0 }
   0xb   : > { %p605_p4 = por %p47_p2, %p46_p1  ;;  %s35_s20 = ssub.s32 %s534_s13, %s766_s17 }
   0xc   : > { %p99_p6 = scmp.eq.s32.totalorder %s339_s15, 1  ;;  %p37_p7 = scmp.eq.s32.totalorder %s35_s20, 0 }
   0xd   : > { %p611_p8 = por %p53_p5, %p52_p3  ;;  %p105_p10 = scmp.eq.s32.totalorder %s340_s16, 1 }
   0xe   : > { %p615_p9 = por %p99_p6, %p46_p1  ;;  %p364_p13 = scmp.lt.s32.totalorder %s538_s14, 2 }
   0xf   : > { %s620_s23 = scalar_select %p37_p7, %s526_s11, %s39_s18  }
  0x10   : > { %s754_s22 = scalar_select %p615_p9, 1, 0 }
  0x11   : > { %p622_p11 = por %p105_p10, %p52_p3  ;;  %s128_s25 = sand.u32 1, %s526_s11  }
  0x12   : > { %s343_s26 = sshll.u32 %s128_s25, 3  ;;  %s344_s27 = sshll.u32 %s534_s13, 6 }
  0x13   : > { %s755_s24 = scalar_select %p622_p11, 1, 0 }
  0x14   : > { %s633_s30 = scalar_lea.hbm %s748_s0, %s344_s27  ;;  %s132_s3 = scalar_lea.vmem [#allocation2], %s343_s26 }
  0x15   : > { %s141_s4 = sshll.u32 %s132_s3, 4  ;;  %p639_p0 = pnand %p364_p13, %p605_p4  ;;  %s635_s4 = int_to_ptr.vmem [resolvable:$true] %s141_s4 }
  0x16   : > { %s643_s6 = scalar_lea.sflag [#allocation3], %s128_s25  ;;  %s426_s7 = scalar_lea.hbm %s633_s30, 128 }
  0x17   : > { %p427_p1 = scmp.ne.s32.totalorder %s633_s30, %s426_s7  ;;  %p428_p2 = pneg %p639_p0 }
  0x18   : > { %s431_s16 = scalar_lea.hbm %s748_s0, 256  ;;  %p432_p4 = scmp.lt.u32.totalorder %s633_s30, %s748_s0 }
  0x19   : > { %p429_p3 = pnand %p428_p2, %p427_p1  ;;  %p433_p6 = scmp.lt.u32.totalorder %s431_s16, %s426_s7 }
  0x1a   : > { %p435_p10 = scmp.lt.u32.totalorder %s426_s7, %s633_s30 }
  0x1b   : > { %p430_p5 = pneg %p429_p3  ;;  %p434_p7 = por %p433_p6, %p432_p4 }
  0x1d   : > { %p436_p13 = por %p435_p10, %p434_p7 }
  0x1f   : > { %p437_p12 = pnand %p436_p13, %p430_p5 }
  0x21   : > { %440 = shalt.err (!%p437_p12)
}
  0x22   : > { %s441_s20 = scalar_lea.vmem %s635_s4, 128  ;;  %s540_s25 = smov [#allocation2]  }
  0x23   : > { %p442_p1 = scmp.ne.s32.totalorder %s635_s4, %s441_s20  ;;  %s446_s26 = sshll.u32 %s540_s25, 4  ;;  %s447_s26 = int_to_ptr.vmem [resolvable:$false] %s446_s26 }
  0x24   : > { %s448_s27 = scalar_lea.vmem %s447_s26, 256  ;;  %p449_p9 = scmp.lt.s32.totalorder %s635_s4, %s447_s26 }
  0x25   : > { %p444_p3 = pnand %p442_p1, %p428_p2  ;;  %p450_p4 = scmp.lt.s32.totalorder %s448_s27, %s441_s20 }
  0x27   : > { %p445_p11 = pneg %p444_p3  ;;  %p451_p6 = por %p450_p4, %p449_p9 }
  0x29   : > { %p452_p7 = pnand %p451_p6, %p445_p11 }
  0x2b   : > { %455 = shalt.err (!%p452_p7)
}
  0x2c   : > { %s541_s28 = smov 128   ;;  %s542_s29 = smov 64  }
  0x2d   : > { %s543_s3 = smov 4   ;;  %p345_p12 = scmp.ge.s32.totalorder %s538_s14, 1 }
  0x2e   : > { %359 = dma.hbm_to_vmem [thread:$0]  (!%p639_p0), %s633_s30, 128, %s635_s4, %s643_s6, %s541_s28, %s542_s29, %s543_s3  }
  0x2f   : > { %p149_p2 = scmp.lt.s32.totalorder %s538_s14, 3 }
  0x31   : > { %p150_p5 = pnand %p345_p12, %p149_p2 }
  0x32   : > { %s674_s7 = sand.u32 (!%p150_p5), 1, %s522_s10  }
  0x33   : > { %153 = sbr.rel (%p150_p5) target bundleno = 207 (0xcf), region = 28  ;;  %s346_s8 = sshll.u32 (!%p150_p5), %s674_s7, 3 }
  0x34   : > { %s156_s15 = scalar_lea.sflag (!%p150_p5), [#allocation3], %s674_s7  ;;  %s159_s16 = scalar_lea.vmem (!%p150_p5), [#allocation2], %s346_s8 }
  0x3a   : > { %509 = dma.done.wait (%p611_p8), %s156_s15, 128  }
  0x3b   : > { %511 = vsyncadd (%p611_p8), %s156_s15, 4294967168  ;;  %v544_v0 = vmov 0   ;;  %v226_v1 = vld [vmem:[%s749_s1] sm:$0xf]  ;;  %vm184_vm0 = vcmask 1043456   ;;  %s179_s21 = scalar_lea.vmem [#allocation5], %s346_s8 }
  0x3c   : > { %421 = vset.pattern.permute.xlu0 %v544_v0  ;;  %v182_v2 = vld [vmem:[%s159_s16] sm:$0xf]  ;;  %v183_v3 = vld [vmem:[%s159_s16 + $0x4] sm:$0xf]  ;;  %s254_s5 = sshll.u32 %s179_s21, 4  ;;  %s349_s6 = sshll.u32 %s530_s12, 6  ;;  %s694_s5 = int_to_ptr.vmem [resolvable:$true] %s254_s5 }
  0x3d   : > { %231 = vperm.xlu0 %421, %v226_v1   ;;  %v185_v4 = vsel %vm184_vm0, %v182_v2, 0.0  ;;  %v192_v5 = vsel %vm184_vm0, %v183_v3, 0.0  ;;  %s699_s20 = scalar_lea.hbm %s750_s2, %s349_s6  ;;  %s239_s25 = scalar_lea.sflag [#allocation4], %s674_s7 }
  0x3e   : > { %v186_v6 = vrot.slane %v185_v4, 4  ;;  %v193_v7 = vrot.slane %v192_v5, 4  ;;  %s456_s26 = scalar_lea.vmem %s694_s5, 128  ;;  %p757_p9 = scmp.ne.s32.totalorder %s754_s22, 0 }
  0x3f   : > { %p457_p8 = scmp.ne.s32.totalorder %s694_s5, %s456_s26  ;;  %s545_s12 = smov [#allocation5]  }
  0x40   : > { %v187_v8 = vadd.f32 %v186_v6, %v185_v4  ;;  %v194_v9 = vadd.f32 %v193_v7, %v192_v5  ;;  %s460_s27 = sshll.u32 %s545_s12, 4  ;;  %s461_s27 = int_to_ptr.vmem [resolvable:$false] %s460_s27 }
  0x41   : > { %p458_p11 = pnand %p457_p8, %p757_p9  ;;  %s462_s28 = scalar_lea.vmem %s461_s27, 256 }
  0x42   : > { %v188_v10 = vrot.slane %v187_v8, 2  ;;  %v195_v11 = vrot.slane %v194_v9, 2  ;;  %p463_p10 = scmp.lt.s32.totalorder %s694_s5, %s461_s27  ;;  %p464_p13 = scmp.lt.s32.totalorder %s462_s28, %s456_s26 }
  0x43   : > { %p459_p0 = pneg %p458_p11 }
  0x44   : > { %v189_v12 = vadd.f32 %v188_v10, %v187_v8  ;;  %v196_v13 = vadd.f32 %v195_v11, %v194_v9  ;;  %p465_p1 = por %p464_p13, %p463_p10 }
  0x46   : > { %v190_v14 = vrot.slane %v189_v12, 1  ;;  %v197_v15 = vrot.slane %v196_v13, 1  ;;  %p466_p3 = pnand %p465_p1, %p459_p0 }
  0x48   : > { %v191_v16 = vadd.f32 %v190_v14, %v189_v12  ;;  %v198_v17 = vadd.f32 %v197_v15, %v196_v13 }
  0x4a   : > { %v200_v18 = vmul.f32 0.25, %v191_v16  ;;  %v201_v19 = vmul.f32 0.25, %v198_v17 }
  0x4c   : > { %v202_v20 = vsub.f32 %v182_v2, %v200_v18  ;;  %v203_v21 = vsub.f32 %v183_v3, %v201_v19 }
  0x4e   : > { %v204_v22 = vmul.f32 %v202_v20, %v202_v20  ;;  %v205_v23 = vmul.f32 %v203_v21, %v203_v21 }
  0x50   : > { %v206_v24 = vsel %vm184_vm0, %v204_v22, 0.0  ;;  %v213_v25 = vsel %vm184_vm0, %v205_v23, 0.0 }
  0x51   : > { %v207_v26 = vrot.slane %v206_v24, 4  ;;  %v214_v27 = vrot.slane %v213_v25, 4 }
  0x53   : > { %v208_v28 = vadd.f32 %v207_v26, %v206_v24  ;;  %v215_v29 = vadd.f32 %v214_v27, %v213_v25 }
  0x55   : > { %v209_v30 = vrot.slane %v208_v28, 2  ;;  %v216_v31 = vrot.slane %v215_v29, 2 }
  0x57   : > { %v210_v32 = vadd.f32 %v209_v30, %v208_v28  ;;  %v217_v33 = vadd.f32 %v216_v31, %v215_v29 }
  0x59   : > { %v211_v34 = vrot.slane %v210_v32, 1  ;;  %v218_v35 = vrot.slane %v217_v33, 1 }
  0x5b   : > { %v212_v36 = vadd.f32 %v211_v34, %v210_v32  ;;  %v219_v37 = vadd.f32 %v218_v35, %v217_v33 }
  0x5d   : > { %v220_v38 = vmul.f32 0.25, %v212_v36  ;;  %v221_v39 = vmul.f32 0.25, %v219_v37 }
  0x5f   : > { %v222_v40 = vadd.f32 1e-05, %v220_v38  ;;  %v223_v41 = vadd.f32 1e-05, %v221_v39 }
  0x61   : > { %422 = vrsqrt.f32 %v222_v40 }
  0x62   : > { %424 = vrsqrt.f32 %v223_v41 }
  0x6b   : > { %v423_v42 = vpop.eup %422 }
  0x6c   : > { %v425_v43 = vpop.eup %424  ;;  %v227_v44 = vmul.f32 %v423_v42, %v202_v20 }
  0x6d   : > { %v228_v45 = vmul.f32 %v425_v43, %v203_v21 }
  0xbc   : > { %v232_v46 = vpop.permute.xlu0 %231 }
  0xbd   : > { %v234_v47 = vmul.f32 %v232_v46, %v227_v44  ;;  %v235_v48 = vmul.f32 %v232_v46, %v228_v45 }
  0xbf   : > { %236 = vst [vmem:[%s179_s21] sm:$0xf] %v234_v47  ;;  %237 = vst [vmem:[%s179_s21 + $0x4] sm:$0xf] %v235_v48 }
  0xc0   : > { %469 = shalt.err (!%p466_p3)
}
  0xc1   : > { %s470_s29 = scalar_lea.hbm %s699_s20, 128  ;;  %s474_s15 = scalar_lea.hbm %s750_s2, 256 }
  0xc2   : > { %p471_p4 = scmp.ne.s32.totalorder %s699_s20, %s470_s29  ;;  %p475_p12 = scmp.lt.u32.totalorder %s699_s20, %s750_s2 }
  0xc3   : > { %p476_p2 = scmp.lt.u32.totalorder %s474_s15, %s470_s29  ;;  %p478_p8 = scmp.lt.u32.totalorder %s470_s29, %s699_s20 }
  0xc4   : > { %p472_p6 = pnand %p471_p4, %p757_p9 }
  0xc5   : > { %p477_p5 = por %p476_p2, %p475_p12 }
  0xc6   : > { %p473_p7 = pneg %p472_p6 }
  0xc7   : > { %p479_p11 = por %p478_p8, %p477_p5 }
  0xc9   : > { %p480_p0 = pnand %p479_p11, %p473_p7 }
  0xcb   : > { %483 = shalt.err (!%p480_p0)
}
  0xcc   : > { %s546_s4 = smov 64   ;;  %s547_s21 = smov 128  }
  0xcd   : > { %s548_s6 = smov 4  }
  0xce   : > { %354 = dma.vmem_to_hbm [thread:$0]  (%p757_p9), %s694_s5, 128, %s699_s20, %s239_s25, %s546_s4, %s547_s21, %s548_s6  }
  0xcf PF: > { %s269_s18 = sand.u32 1, %s518_s9   ;;  %p758_p10 = scmp.ne.s32.totalorder %s755_s24, 0 }
  0xd0   : > { %p759_p13 = scmp.ge.s32.totalorder %s538_s14, 2  ;;  %s270_s19 = scalar_lea.sflag [#allocation4], %s269_s18 }
  0xd2   : > { %p361_p1 = pnand %p759_p13, %p758_p10 }
  0xd4   : > { %513 = dma.done.wait (!%p361_p1), %s270_s19, 128  }
  0xd5   : > { %515 = vsyncadd (!%p361_p1), %s270_s19, 4294967168  ;;  %s18_s14 = sadd.s32 1, %s538_s14   ;;  %s760_s9 = smov %s522_s10 }
  0xd6   : > { %p15_p3 = scmp.ge.s32.totalorder %s18_s14, 4   ;;  %s761_s10 = smov %s526_s11 }
  0xd7   : > { %s762_s11 = smov %s620_s23  ;;  %s763_s12 = smov %s534_s13 }
  0xd8   : > { %s764_s13 = smov %s766_s17  ;;  %17 = sbr.rel (!%p15_p3) target bundleno = 6 (0x6), region = 73 }
  0xdf   :  { %275 = vsyncpa [#allocation3], 1 }
  0xe0   :  { %277 = vsyncpa [#allocation3 + $0x1], 1 }
  0xe1   :  { %278 = vsyncpa [#allocation4], 1 }
  0xe2   :  { %280 = vsyncpa [#allocation4 + $0x1], 1 }

</bundles_post_ra>
